<compile_context>
chip_gen: v7x
topology: tpu7x:2x2x1
jax: 0.10.0
libtpu: 0.0.40
codegen_flags: <defaults>
</compile_context>

<pallas_src>
import jax
import jax.numpy as jnp
from jax.experimental import pallas as pl
from jax.experimental.pallas import tpu as pltpu

LANES = 128
ACC_ROWS = 8     # vreg sublanes; per-chunk accumulator tile is (8, 128) f32
ROW_ALIGN = 32   # row-tile multiple: covers f32 (8) / bf16 (16) / int8 (32) packing


def _round_up(x, m):
    return ((x + m - 1) // m) * m


def _tpu_defaults():
    """(max_row_tile, vmem_limit_cap_bytes, core_split) per TPU generation."""
    kind = ""
    try:
        kind = jax.devices()[0].device_kind.lower()
    except Exception:
        pass
    if "v2" in kind or "v3" in kind:
        return 2048, 12 << 20, 1          # 16 MiB VMEM parts
    if "v4" in kind or "v5" in kind or "v6" in kind:
        return 16384, 100 << 20, 1        # 128 MiB VMEM, 1 TC visible per device
    if "7" in kind:
        return 8192, 56 << 20, 2          # v7x: 64 MiB VMEM per TC, 2 TCs per chip
    return 8192, 48 << 20, 1              # unknown: conservative, fits 64 MiB VMEM


def _make_ssd_kernel(steps, row_tile, valid_rows):
    """Per-chunk sum of squared differences, accumulated directly into out_ref."""

    def kernel(img_ref, gt_ref, out_ref):
        c = pl.program_id(0)
        s = pl.program_id(1)

        @pl.when(s == 0)
        def _():
            out_ref[...] = jnp.zeros_like(out_ref)

        diff = img_ref[...].astype(jnp.float32) - gt_ref[...].astype(jnp.float32)
        sq = diff * diff

        # Rows of this (possibly boundary / clamped-duplicate) block that hold
        # real data. `valid_rows`, `steps`, `row_tile` are static Python ints.
        block_start = (c * steps + s) * row_tile
        n_valid = valid_rows - block_start

        @pl.when(n_valid >= row_tile)
        def _():  # interior block: pure VPU accumulation, no masking cost
            out_ref[...] += jnp.sum(sq.reshape(-1, ACC_ROWS, LANES), axis=0)[None]

        @pl.when(n_valid < row_tile)
        def _():  # boundary (or fully out-of-range) block: select-mask OOB rows
            row_ids = jax.lax.broadcasted_iota(jnp.int32, (row_tile, LANES), 0)
            masked = jnp.where(row_ids < n_valid, sq, 0.0)
            out_ref[...] += jnp.sum(masked.reshape(-1, ACC_ROWS, LANES), axis=0)[None]

    return kernel


def _ssd_partials(img2d, gt2d, *, chunks, steps, row_tile, valid_rows,
                  core_parallel, vmem_limit):
    last_block = pl.cdiv(valid_rows, row_tile) - 1

    def in_map(c, s):
        # Clamp so an over-covering grid step never requests an OOB block; the
        # kernel masks such duplicate blocks down to zero contribution.
        return (jnp.minimum(c * steps + s, last_block), 0)

    if core_parallel:
        dim_sems = (pltpu.CORE_PARALLEL, pltpu.ARBITRARY)
    else:
        dim_sems = ("parallel", "arbitrary")

    return pl.pallas_call(
        _make_ssd_kernel(steps, row_tile, valid_rows),
        out_shape=jax.ShapeDtypeStruct((chunks, ACC_ROWS, LANES), jnp.float32),
        grid_spec=pltpu.PrefetchScalarGridSpec(
            num_scalar_prefetch=0,
            grid=(chunks, steps),
            in_specs=[
                pl.BlockSpec((row_tile, LANES), in_map),
                pl.BlockSpec((row_tile, LANES), in_map),
            ],
            out_specs=pl.BlockSpec((1, ACC_ROWS, LANES), lambda c, s: (c, 0, 0)),
        ),
        compiler_params=pltpu.CompilerParams(
            dimension_semantics=dim_sems,
            vmem_limit_bytes=vmem_limit,
        ),
    )(img2d, gt2d)


def psnr(image, gt):
    """PSNR with peak signal 1.0 (normalized images), matching the reference."""
    assert image.shape == gt.shape
    n_elems = image.size

    img = image.reshape(-1)
    gtf = gt.reshape(-1)

    # Lane-dense (rows, 128) layout. Only pad (a full-array copy) in the rare
    # case the element count is not already 128-aligned; identical zero pad on
    # both inputs leaves the SSD unchanged.
    if n_elems % LANES:
        pad = LANES - n_elems % LANES
        img = jnp.pad(img, (0, pad))
        gtf = jnp.pad(gtf, (0, pad))
    rows = img.shape[0] // LANES
    img2d = img.reshape(rows, LANES)
    gt2d = gtf.reshape(rows, LANES)

    max_row_tile, vmem_cap, core_split = _tpu_defaults()
    row_tile = min(max_row_tile, _round_up(rows, ROW_ALIGN))
    total_tiles = pl.cdiv(rows, row_tile)
    chunks = core_split if (core_split > 1 and total_tiles >= core_split) else 1
    steps = pl.cdiv(total_tiles, chunks)

    itemsize = max(jnp.dtype(image.dtype).itemsize, jnp.dtype(gt.dtype).itemsize)
    tile_bytes = row_tile * LANES * itemsize
    # 2 inputs x double buffer + headroom for fused elementwise temporaries.
    vmem_limit = int(min(vmem_cap, max(16 << 20, 8 * tile_bytes + (4 << 20))))

    kwargs = dict(chunks=chunks, steps=steps, row_tile=row_tile,
                  valid_rows=rows, vmem_limit=vmem_limit)
    if chunks > 1:
        try:
            partials = _ssd_partials(img2d, gt2d, core_parallel=True, **kwargs)
        except Exception:
            # CORE_PARALLEL lowering unavailable on this chip/runtime ->
            # fall back to a plain grid on one core.
            partials = _ssd_partials(img2d, gt2d, core_parallel=False, **kwargs)
    else:
        partials = _ssd_partials(img2d, gt2d, core_parallel=False, **kwargs)

    ssd = jnp.sum(partials)
    # mse = ssd / N ; psnr = 10 * log10(1.0**2 / mse) = 10 * log10(N / ssd)
    return 10.0 * jnp.log10(jnp.float32(n_elems) / ssd)


def psnr_ref(image, gt):
    mse = jnp.mean((image.astype(jnp.float32) - gt.astype(jnp.float32)) ** 2)
    return 10.0 * jnp.log10(1.0 / mse)


if __name__ == "__main__":
    key = jax.random.PRNGKey(0)
    k1, k2, k3, k4, k5, k6 = jax.random.split(key, 6)

    # NCHW inputs, like the PyTorch module would receive (values in [0, 1)).
    shape = (2, 4, 16, 16)
    image = jax.random.uniform(k1, shape, dtype=jnp.float32)
    gt = jax.random.uniform(k2, shape, dtype=jnp.float32)
    out = jax.block_until_ready(psnr(image, gt))
    ref = jax.block_until_ready(psnr_ref(image, gt))
    assert jnp.allclose(out, ref, rtol=1e-4, atol=1e-4), (out, ref)

    # Odd size: exercises the lane-pad + masked boundary-block path.
    shape2 = (2, 3, 33, 17)
    image2 = jax.random.uniform(k3, shape2, dtype=jnp.float32)
    gt2 = jax.random.uniform(k4, shape2, dtype=jnp.float32)
    out2 = jax.block_until_ready(psnr(image2, gt2))
    ref2 = jax.block_until_ready(psnr_ref(image2, gt2))
    assert jnp.allclose(out2, ref2, rtol=1e-4, atol=1e-4), (out2, ref2)

    # Larger image: exercises multi-tile accumulation / chunked grid, no pad.
    shape3 = (1, 3, 640, 640)
    image3 = jax.random.uniform(k5, shape3, dtype=jnp.float32)
    gt3 = jax.random.uniform(k6, shape3, dtype=jnp.float32)
    out3 = jax.block_until_ready(psnr(image3, gt3))
    ref3 = jax.block_until_ready(psnr_ref(image3, gt3))
    assert jnp.allclose(out3, ref3, rtol=1e-4, atol=1e-4), (out3, ref3)

    print("KERNEL_OK")
</pallas_src>

<mosaic_0001>
module attributes {stable_mosaic.version = 11 : i64} {
  func.func @kernel(%arg0: i32, %arg1: i32, %arg2: memref<32x128xf32, #tpu.memory_space<vmem>>, %arg3: memref<32x128xf32, #tpu.memory_space<vmem>>, %arg4: memref<1x8x128xf32, #tpu.memory_space<vmem>>) attributes {dimension_semantics = [#tpu.dimension_semantics<parallel>, #tpu.dimension_semantics<arbitrary>], iteration_bounds = array<i64: 1, 1>, scalar_prefetch = 0 : i64, scratch_operands = 0 : i64, tpu.core_type = #tpu.core_type<tc>, window_params = [{transform_indices = @transform_0, window_bounds = array<i64: 32, 128>}, {transform_indices = @transform_1, window_bounds = array<i64: 32, 128>}, {transform_indices = @transform_2, window_bounds = array<i64: 1, 8, 128>}]} {
    %c0_i32 = arith.constant 0 : i32
    %0 = arith.cmpi eq, %arg1, %c0_i32 : i32
    %1 = arith.extui %0 : i1 to i32
    %c0_i32_0 = arith.constant 0 : i32
    %2 = arith.cmpi ne, %1, %c0_i32_0 : i32
    scf.if %2 {
      %cst = arith.constant 0.000000e+00 : f32
      %17 = vector.broadcast %cst : f32 to vector<1x8x128xf32>
      %c0_8 = arith.constant 0 : index
      %c0_9 = arith.constant 0 : index
      %c0_10 = arith.constant 0 : index
      %18 = vector.load %arg4[%c0_8, %c0_9, %c0_10] : memref<1x8x128xf32, #tpu.memory_space<vmem>>, vector<1x8x128xf32>
      tpu.vector_store %arg4[%c0_8, %c0_9, %c0_10], %17 {strides = array<i32>} : memref<1x8x128xf32, #tpu.memory_space<vmem>>, vector<1x8x128xf32>,
    } else {
    }
    %c0 = arith.constant 0 : index
    %c0_1 = arith.constant 0 : index
    %3 = vector.load %arg2[%c0, %c0_1] : memref<32x128xf32, #tpu.memory_space<vmem>>, vector<32x128xf32>
    %c0_2 = arith.constant 0 : index
    %c0_3 = arith.constant 0 : index
    %4 = vector.load %arg3[%c0_2, %c0_3] : memref<32x128xf32, #tpu.memory_space<vmem>>, vector<32x128xf32>
    %5 = arith.subf %3, %4 : vector<32x128xf32>
    %6 = arith.mulf %5, %5 : vector<32x128xf32>
    %c1_i32 = arith.constant 1 : i32
    %7 = arith.muli %arg0, %c1_i32 : i32
    %8 = arith.addi %7, %arg1 : i32
    %c32_i32 = arith.constant 32 : i32
    %9 = arith.muli %8, %c32_i32 : i32
    %c16_i32 = arith.constant 16 : i32
    %10 = arith.subi %c16_i32, %9 : i32
    %c32_i32_4 = arith.constant 32 : i32
    %11 = arith.cmpi sge, %10, %c32_i32_4 : i32
    %12 = arith.extui %11 : i1 to i32
    %c0_i32_5 = arith.constant 0 : i32
    %13 = arith.cmpi ne, %12, %c0_i32_5 : i32
    scf.if %13 {
      %c0_8 = arith.constant 0 : index
      %c0_9 = arith.constant 0 : index
      %c0_10 = arith.constant 0 : index
      %17 = vector.load %arg4[%c0_8, %c0_9, %c0_10] : memref<1x8x128xf32, #tpu.memory_space<vmem>>, vector<1x8x128xf32>
      %18 = vector.shape_cast %6 : vector<32x128xf32> to vector<4x8x128xf32>
      %cst = arith.constant dense<0.000000e+00> : vector<8x128xf32>
      %19 = vector.multi_reduction <add>, %18, %cst [0] : vector<4x8x128xf32> to vector<8x128xf32>
      %20 = vector.shape_cast %19 : vector<8x128xf32> to vector<1x8x128xf32>
      %21 = arith.addf %17, %20 : vector<1x8x128xf32>
      %c0_11 = arith.constant 0 : index
      %c0_12 = arith.constant 0 : index
      %c0_13 = arith.constant 0 : index
      %22 = vector.load %arg4[%c0_11, %c0_12, %c0_13] : memref<1x8x128xf32, #tpu.memory_space<vmem>>, vector<1x8x128xf32>
      tpu.vector_store %arg4[%c0_11, %c0_12, %c0_13], %21 {strides = array<i32>} : memref<1x8x128xf32, #tpu.memory_space<vmem>>, vector<1x8x128xf32>,
    } else {
    }
    %c32_i32_6 = arith.constant 32 : i32
    %14 = arith.cmpi slt, %10, %c32_i32_6 : i32
    %15 = arith.extui %14 : i1 to i32
    %c0_i32_7 = arith.constant 0 : i32
    %16 = arith.cmpi ne, %15, %c0_i32_7 : i32
    scf.if %16 {
      %17 = tpu.iota {dimensions = array<i32: 0>} : vector<32x128xi32>
      %18 = vector.broadcast %10 : i32 to vector<32x128xi32>
      %19 = arith.cmpi slt, %17, %18 : vector<32x128xi32>
      %cst = arith.constant 0.000000e+00 : f32
      %20 = vector.broadcast %cst : f32 to vector<32x128xf32>
      %21 = arith.select %19, %6, %20 : vector<32x128xi1>, vector<32x128xf32>
      %c0_8 = arith.constant 0 : index
      %c0_9 = arith.constant 0 : index
      %c0_10 = arith.constant 0 : index
      %22 = vector.load %arg4[%c0_8, %c0_9, %c0_10] : memref<1x8x128xf32, #tpu.memory_space<vmem>>, vector<1x8x128xf32>
      %23 = vector.shape_cast %21 : vector<32x128xf32> to vector<4x8x128xf32>
      %cst_11 = arith.constant dense<0.000000e+00> : vector<8x128xf32>
      %24 = vector.multi_reduction <add>, %23, %cst_11 [0] : vector<4x8x128xf32> to vector<8x128xf32>
      %25 = vector.shape_cast %24 : vector<8x128xf32> to vector<1x8x128xf32>
      %26 = arith.addf %22, %25 : vector<1x8x128xf32>
      %c0_12 = arith.constant 0 : index
      %c0_13 = arith.constant 0 : index
      %c0_14 = arith.constant 0 : index
      %27 = vector.load %arg4[%c0_12, %c0_13, %c0_14] : memref<1x8x128xf32, #tpu.memory_space<vmem>>, vector<1x8x128xf32>
      tpu.vector_store %arg4[%c0_12, %c0_13, %c0_14], %26 {strides = array<i32>} : memref<1x8x128xf32, #tpu.memory_space<vmem>>, vector<1x8x128xf32>,
    } else {
    }
    return
  }
  func.func @transform_0(%arg0: i32, %arg1: i32) -> (i32, i32) {
    %c1_i32 = arith.constant 1 : i32
    %0 = arith.muli %arg0, %c1_i32 : i32
    %1 = arith.addi %0, %arg1 : i32
    %c0_i32 = arith.constant 0 : i32
    %2 = arith.minsi %1, %c0_i32 : i32
    %c0_i32_0 = arith.constant 0 : i32
    %c0_i32_1 = arith.constant 0 : i32
    return %2, %c0_i32_0 : i32, i32
  }
  func.func @transform_1(%arg0: i32, %arg1: i32) -> (i32, i32) {
    %c1_i32 = arith.constant 1 : i32
    %0 = arith.muli %arg0, %c1_i32 : i32
    %1 = arith.addi %0, %arg1 : i32
    %c0_i32 = arith.constant 0 : i32
    %2 = arith.minsi %1, %c0_i32 : i32
    %c0_i32_0 = arith.constant 0 : i32
    %c0_i32_1 = arith.constant 0 : i32
    return %2, %c0_i32_0 : i32, i32
  }
  func.func @transform_2(%arg0: i32, %arg1: i32) -> (i32, i32, i32) {
    %c0_i32 = arith.constant 0 : i32
    %c0_i32_0 = arith.constant 0 : i32
    %c0_i32_1 = arith.constant 0 : i32
    return %arg0, %c0_i32, %c0_i32_0 : i32, i32, i32
  }
}

</mosaic_0001>

<bundles_post_ra>
// kernel: tpu_custom_call.1
= control target key start
LH: loop header
LB: loop body
LE: loop exit
PB: predicated region body
PF: predicated region fallthrough
CT: control target
= control target key end

     0   :  { %7 = vsyncpa [#allocation3], 0  ;;  %s284_s0 = inlined_call_operand.hbm [shape: f32[16,128], index: 0, kind: input, shape index: {}]   ;;  %s285_s1 = inlined_call_operand.hbm [shape: f32[16,128], index: 1, kind: input, shape index: {}]   ;;  %s286_s2 = inlined_call_operand.hbm [shape: f32[1,8,128], index: 2, kind: output, shape index: {}]  }
   0x1   :  { %8 = vsyncpa [#allocation6], 0 }
   0x2   :  { %9 = vsyncpa [#allocation4], 0 }
   0x3   :  { %20 = vsyncadd [#allocation3], 256  ;;  %s228_s9 = smov [#allocation2]   ;;  %s156_s13 = scalar_lea.hbm %s284_s0, 256 }
   0x4   :  { %s25_s10 = sshll.u32 %s228_s9, 4  ;;  %p157_p0 = scmp.ne.s32.totalorder %s284_s0, %s156_s13  ;;  %s26_s10 = int_to_ptr.vmem [resolvable:$true] %s25_s10 }
   0x5   :  { %p160_p1 = scmp.lt.u32.totalorder %s156_s13, %s284_s0 }
   0x7   :  { %p162_p2 = pnand %p160_p1, %p157_p0 }
   0x9   :  { %165 = shalt.err (!%p162_p2)
}
   0xa   :  { %s166_s18 = scalar_lea.vmem %s26_s10, 256  ;;  %s170_s19 = scalar_lea.vmem %s26_s10, 512 }
   0xb   :  { %p167_p3 = scmp.ne.s32.totalorder %s26_s10, %s166_s18  ;;  %p171_p4 = scmp.lt.s32.totalorder %s26_s10, %s26_s10 }
   0xc   :  { %p172_p5 = scmp.lt.s32.totalorder %s170_s19, %s166_s18 }
   0xe   :  { %p173_p6 = por %p172_p5, %p171_p4 }
  0x10   :  { %p174_p7 = pnand %p173_p6, %p167_p3 }
  0x12   :  { %177 = shalt.err (!%p174_p7)
}
  0x13   :  { %s229_s20 = smov 128   ;;  %s230_s21 = smov 8  }
  0x14   :  { %31 = dma.hbm_to_vmem [thread:$0]  %s284_s0, 256, %s26_s10, [#allocation3], %s229_s20, %s229_s20, %s230_s21  }
  0x15   :  { %42 = vsyncadd [#allocation6], 256  ;;  %s231_s24 = smov [#allocation5]   ;;  %s178_s28 = scalar_lea.hbm %s285_s1, 256 }
  0x16   :  { %s47_s25 = sshll.u32 %s231_s24, 4  ;;  %p179_p8 = scmp.ne.s32.totalorder %s285_s1, %s178_s28  ;;  %s48_s25 = int_to_ptr.vmem [resolvable:$true] %s47_s25 }
  0x17   :  { %p182_p9 = scmp.lt.u32.totalorder %s178_s28, %s285_s1 }
  0x19   :  { %p184_p10 = pnand %p182_p9, %p179_p8 }
  0x1b   :  { %187 = shalt.err (!%p184_p10)
}
  0x1c   :  { %s188_s5 = scalar_lea.vmem %s48_s25, 256  ;;  %s192_s0 = scalar_lea.vmem %s48_s25, 512 }
  0x1d   :  { %p189_p11 = scmp.ne.s32.totalorder %s48_s25, %s188_s5  ;;  %p193_p12 = scmp.lt.s32.totalorder %s48_s25, %s48_s25 }
  0x1e   :  { %p194_p13 = scmp.lt.s32.totalorder %s192_s0, %s188_s5 }
  0x20   :  { %p195_p0 = por %p194_p13, %p193_p12 }
  0x22   :  { %p196_p1 = pnand %p195_p0, %p189_p11 }
  0x24   :  { %199 = shalt.err (!%p196_p1)
}
  0x25   :  { %53 = dma.hbm_to_vmem [thread:$0]  %s285_s1, 256, %s48_s25, [#allocation6], %s229_s20, %s229_s20, %s230_s21  }
  0x26   :  { %222 = dma.done.wait [#allocation3], 512  }
  0x27   :  { %223 = vsyncadd [#allocation3], 4294966784 }
  0x28   :  { %224 = dma.done.wait [#allocation6], 512  }
  0x29   :  { %225 = vsyncadd [#allocation6], 4294966784  ;;  %v77_v0 = vld [vmem:[#allocation2] sm:$0xff]  ;;  %v78_v1 = vld [vmem:[#allocation2 + $0x8] sm:$0xff]  ;;  %s232_s8 = smov [#allocation7]  }
  0x2a   :  { %v81_v2 = vld [vmem:[#allocation5] sm:$0xff]  ;;  %v82_v3 = vld [vmem:[#allocation5 + $0x8] sm:$0xff]  ;;  %s136_s9 = sshll.u32 %s232_s8, 4  ;;  %s137_s9 = int_to_ptr.vmem [resolvable:$true] %s136_s9 }
  0x2b   :  { %v85_v4 = vsub.f32 %v77_v0, %v81_v2  ;;  %v86_v5 = vsub.f32 %v78_v1, %v82_v3  ;;  %s200_s10 = scalar_lea.vmem %s137_s9, 128  ;;  %p205_p3 = scmp.lt.s32.totalorder %s137_s9, %s137_s9 }
  0x2c   :  { %p201_p2 = scmp.ne.s32.totalorder %s137_s9, %s200_s10  ;;  %p206_p4 = scmp.lt.s32.totalorder %s200_s10, %s200_s10 }
  0x2d   :  { %v89_v6 = vmul.f32 %v85_v4, %v85_v4  ;;  %v90_v7 = vmul.f32 %v86_v5, %v86_v5 }
  0x2e   :  { %p207_p5 = por %p206_p4, %p205_p3 }
  0x2f   :  { %v125_v8 = vadd.f32 %v90_v7, %v89_v6 }
  0x30   :  { %p208_p6 = pnand %p207_p5, %p201_p2 }
  0x31   :  { %129 = vst [vmem:[#allocation7] sm:$0xff] %v125_v8 }
  0x32   :  { %211 = shalt.err (!%p208_p6)
}
  0x33   :  { %s212_s12 = scalar_lea.hbm %s286_s2, 128 }
  0x34   :  { %p213_p7 = scmp.ne.s32.totalorder %s286_s2, %s212_s12  ;;  %p216_p8 = scmp.lt.u32.totalorder %s212_s12, %s286_s2 }
  0x36   :  { %p218_p9 = pnand %p216_p8, %p213_p7 }
  0x38   :  { %221 = shalt.err (!%p218_p9)
}
  0x39   :  { %139 = dma.vmem_to_hbm [thread:$0]  %s137_s9, 128, %s286_s2, [#allocation4]  }
  0x3a   :  { %226 = dma.done.wait [#allocation4], 128  }
  0x3b   :  { %227 = vsyncadd [#allocation4], 4294967168 }
  0x3c   :  { %143 = vsyncpa [#allocation3], 1 }
  0x3d   :  { %144 = vsyncpa [#allocation6], 1 }
  0x3e   :  { %145 = vsyncpa [#allocation4], 1 }

</bundles_post_ra>
